<compile_context>
chip_gen: v6e
topology: v6e:2x2x1
jax: 0.10.0
libtpu: 0.0.40
codegen_flags: <defaults>
</compile_context>

<pallas_src>
import functools
import math

import numpy as np
import jax
import jax.numpy as jnp
from jax import lax
from jax.experimental import pallas as pl
from jax.experimental.pallas import tpu as pltpu

_MIB = 1024 * 1024


def _dft_numpy(a, b):
    """rfft2 / irfft2 over (a, b) with ortho norm as four real matrices.

    Channels-last convention (x flattened to (a*b, C)):
      forward:  Xr = fre @ x,  Xi = fim @ x          fre/fim: (a*wf, a*b)
      inverse:  y  = gre @ Yr + gim @ Yi             gre/gim: (a*b, a*wf)
    The Hermitian-fold weights (1 for DC / Nyquist columns, 2 otherwise) are
    baked into gre/gim.
    """
    wf = b // 2 + 1
    scale = 1.0 / math.sqrt(a * b)

    k1 = np.arange(a).reshape(a, 1, 1, 1)
    k2 = np.arange(wf).reshape(1, wf, 1, 1)
    n1 = np.arange(a).reshape(1, 1, a, 1)
    n2 = np.arange(b).reshape(1, 1, 1, b)
    th_f = 2.0 * np.pi * (k1 * n1 / a + k2 * n2 / b)              # (a, wf, a, b)
    fre = (np.cos(th_f) * scale).reshape(a * wf, a * b)
    fim = (-np.sin(th_f) * scale).reshape(a * wf, a * b)

    c = np.full((wf,), 2.0)
    c[0] = 1.0
    if b % 2 == 0:
        c[-1] = 1.0
    n1i = np.arange(a).reshape(a, 1, 1, 1)
    n2i = np.arange(b).reshape(1, b, 1, 1)
    k1i = np.arange(a).reshape(1, 1, a, 1)
    k2i = np.arange(wf).reshape(1, 1, 1, wf)
    th_i = 2.0 * np.pi * (k1i * n1i / a + k2i * n2i / b)          # (a, b, a, wf)
    cw = c.reshape(1, 1, 1, wf)
    gre = (cw * np.cos(th_i) * scale).reshape(a * b, a * wf)
    gim = (-cw * np.sin(th_i) * scale).reshape(a * b, a * wf)
    return fre, fim, gre, gim


@functools.lru_cache(maxsize=None)
def _dft_mats_cl(a, b, dtype):
    """Channels-last layout: fre/fim (hk, N), gre/gim (N, hk)."""
    fre, fim, gre, gim = _dft_numpy(a, b)
    return tuple(jnp.asarray(m, dtype) for m in (fre, fim, gre, gim))


@functools.lru_cache(maxsize=None)
def _dft_mats_ct(a, b, dtype):
    """Channel-transposed layout: fre^T/fim^T (N, hk), gre^T/gim^T (hk, N)."""
    fre, fim, gre, gim = _dft_numpy(a, b)
    return tuple(jnp.asarray(np.ascontiguousarray(m.T), dtype)
                 for m in (fre, fim, gre, gim))


def _vmem_limit(slab_bytes, const_bytes):
    # Double-buffered per-step slabs + resident constants, 2x headroom,
    # clamped to [32 MiB, 64 MiB] (v7x physical VMEM is 64 MiB per core;
    # v5e's default scoped limit is only 16 MiB, so raise it explicitly).
    need = 2 * (2 * slab_bytes + const_bytes)
    return int(min(max(need, 32 * _MIB), 64 * _MIB))


# --------------------------------------------------------------------------- #
# Kernels
# --------------------------------------------------------------------------- #
def _gf_kernel_ct(x_ref, fret_ref, fimt_ref, wr_ref, wi_ref,
                  gret_ref, gimt_ref, o_ref):
    """Channel-transposed orientation: lanes carry a*wf / N (dense even for tiny C).

    x_ref:  (1, N, C)  native dtype     fret/fimt: (N, hk)  transform dtype
    wr/wi:  (C, hk)    f32              gret/gimt: (hk, N)  transform dtype
    o_ref:  (1, C, N)  f32
    """
    tdt = fret_ref.dtype
    xb = x_ref[0].astype(tdt)                                     # (N, C)
    # Contract over N with the lhs "transposed" (x^T @ F^T) — stays on the MXU.
    tn = (((0,), (0,)), ((), ()))
    xr = lax.dot_general(xb, fret_ref[...], tn,
                         preferred_element_type=jnp.float32)      # (C, hk)
    xi = lax.dot_general(xb, fimt_ref[...], tn,
                         preferred_element_type=jnp.float32)      # (C, hk)

    wr = wr_ref[...]
    wi = wi_ref[...]
    yr = (xr * wr - xi * wi).astype(tdt)                          # complex mult (VPU, f32)
    yi = (xr * wi + xi * wr).astype(tdt)

    # Inverse transform as two accumulated dots (no concatenate / relayout copy).
    o = jnp.dot(yr, gret_ref[...], preferred_element_type=jnp.float32)   # (C, N)
    o += jnp.dot(yi, gimt_ref[...], preferred_element_type=jnp.float32)
    o_ref[0] = o                                                  # lane-dense (N) store


def _gf_kernel_cl(x_ref, fre_ref, fim_ref, wr_ref, wi_ref,
                  gre_ref, gim_ref, o_ref):
    """Channels-last orientation: lanes carry a C-tile that is a 128 multiple.

    x_ref:  (1, N, Ct)  native dtype    fre/fim: (hk, N)  transform dtype
    wr/wi:  (hk, Ct)    f32             gre/gim: (N, hk)  transform dtype
    o_ref:  (1, N, Ct)  f32
    """
    tdt = fre_ref.dtype
    xb = x_ref[0].astype(tdt)                                     # (N, Ct)
    xr = jnp.dot(fre_ref[...], xb, preferred_element_type=jnp.float32)   # (hk, Ct)
    xi = jnp.dot(fim_ref[...], xb, preferred_element_type=jnp.float32)

    wr = wr_ref[...]
    wi = wi_ref[...]
    yr = (xr * wr - xi * wi).astype(tdt)
    yi = (xr * wi + xi * wr).astype(tdt)

    o = jnp.dot(gre_ref[...], yr, preferred_element_type=jnp.float32)    # (N, Ct)
    o += jnp.dot(gim_ref[...], yi, preferred_element_type=jnp.float32)
    o_ref[0] = o


# --------------------------------------------------------------------------- #
# Jitted device-side impls
# --------------------------------------------------------------------------- #
@jax.jit
def _gf_ct_impl(x, complex_weight, fret, fimt, gret, gimt):
    B, N, C = x.shape
    hk = fret.shape[1]
    tbytes = fret.dtype.itemsize

    # Weights in the transposed layout (C, hk), kept f32 for the VPU multiply.
    wr = jnp.transpose(complex_weight[..., 0], (2, 0, 1)).reshape(C, hk).astype(jnp.float32)
    wi = jnp.transpose(complex_weight[..., 1], (2, 0, 1)).reshape(C, hk).astype(jnp.float32)

    slab = N * C * (x.dtype.itemsize + 4)                 # x block + f32 out block
    const = 4 * N * hk * tbytes + 2 * C * hk * 4          # DFT matrices + weights
    const_spec = lambda shape: pl.BlockSpec(shape, lambda i: (0, 0))

    out = pl.pallas_call(
        _gf_kernel_ct,
        out_shape=jax.ShapeDtypeStruct((B, C, N), jnp.float32),
        grid=(B,),
        in_specs=[
            pl.BlockSpec((1, N, C), lambda i: (i, 0, 0)),         # x slab (one batch)
            const_spec((N, hk)), const_spec((N, hk)),             # forward DFT (resident)
            const_spec((C, hk)), const_spec((C, hk)),             # weights (resident)
            const_spec((hk, N)), const_spec((hk, N)),             # inverse DFT (resident)
        ],
        out_specs=pl.BlockSpec((1, C, N), lambda i: (i, 0, 0)),
        compiler_params=pltpu.CompilerParams(
            dimension_semantics=("parallel",),
            vmem_limit_bytes=_vmem_limit(slab, const)),
    )(x, fret, fimt, wr, wi, gret, gimt)

    # Layout plumbing only: present the result back as (B, N, C).
    return jnp.transpose(out, (0, 2, 1))


@jax.jit
def _gf_cl_impl(x, complex_weight, fre, fim, gre, gim):
    B, N, C = x.shape
    hk = fre.shape[0]
    tbytes = fre.dtype.itemsize

    wr = complex_weight[..., 0].reshape(hk, C).astype(jnp.float32)
    wi = complex_weight[..., 1].reshape(hk, C).astype(jnp.float32)

    ct = 256 if C % 256 == 0 else 128                      # full-width MXU tiles on v6e/v7x
    slab = N * ct * (x.dtype.itemsize + 4) + 2 * hk * ct * 4
    const = 4 * N * hk * tbytes
    dft_spec = lambda shape: pl.BlockSpec(shape, lambda i, j: (0, 0))

    out = pl.pallas_call(
        _gf_kernel_cl,
        out_shape=jax.ShapeDtypeStruct((B, N, C), jnp.float32),
        grid=(B, C // ct),
        in_specs=[
            pl.BlockSpec((1, N, ct), lambda i, j: (i, 0, j)),     # x slab (batch, C-tile)
            dft_spec((hk, N)), dft_spec((hk, N)),                 # forward DFT (resident)
            pl.BlockSpec((hk, ct), lambda i, j: (0, j)),          # weight tile (real)
            pl.BlockSpec((hk, ct), lambda i, j: (0, j)),          # weight tile (imag)
            dft_spec((N, hk)), dft_spec((N, hk)),                 # inverse DFT (resident)
        ],
        out_specs=pl.BlockSpec((1, N, ct), lambda i, j: (i, 0, j)),
        compiler_params=pltpu.CompilerParams(
            dimension_semantics=("parallel", "parallel"),
            vmem_limit_bytes=_vmem_limit(slab, const)),
    )(x, fre, fim, wr, wi, gre, gim)
    return out


# --------------------------------------------------------------------------- #
# Public wrapper (mirrors GlobalFilter.forward)
# --------------------------------------------------------------------------- #
def global_filter(x, complex_weight, spatial_size=None, transform_dtype=jnp.bfloat16):
    """x: (B, N, C) any float dtype; complex_weight: (a, b//2+1, C, 2) float32.

    Returns float32 (B, N, C) (the torch module casts to float32 before the FFT).
    Non-square spatial grids must pass spatial_size=(a, b).
    transform_dtype: dtype of the DFT matrices / MXU operands. bf16 is accurate to
    ~3 significant digits; pass jnp.float32 for higher accuracy at large a*b.
    """
    B, N, C = x.shape
    if spatial_size is None:
        a = b = int(math.sqrt(N))
    else:
        a, b = spatial_size
    wf = b // 2 + 1
    assert a * b == N, "N must equal a*b (pass spatial_size for non-square grids)"
    assert complex_weight.shape == (a, wf, C, 2)

    if C % 128 == 0:
        # C is already lane-dense: channels-last orientation, no wrapper transposes.
        fre, fim, gre, gim = _dft_mats_cl(a, b, transform_dtype)
        return _gf_cl_impl(x, complex_weight, fre, fim, gre, gim)

    # Small / odd C: channel-transposed orientation so the MXU columns and the
    # output stores are driven by the big dims (a*wf, N) instead of C.
    fret, fimt, gret, gimt = _dft_mats_ct(a, b, transform_dtype)
    return _gf_ct_impl(x, complex_weight, fret, fimt, gret, gimt)


# --------------------------------------------------------------------------- #
# Reference + test
# --------------------------------------------------------------------------- #
def _reference_numpy(x, complex_weight, a, b):
    B, N, C = x.shape
    xr = np.asarray(x, np.float32).reshape(B, a, b, C)
    X = np.fft.rfft2(xr, axes=(1, 2), norm="ortho")
    w = np.asarray(complex_weight[..., 0]) + 1j * np.asarray(complex_weight[..., 1])
    X = X * w
    y = np.fft.irfft2(X, s=(a, b), axes=(1, 2), norm="ortho")
    return y.reshape(B, N, C).astype(np.float32)


if __name__ == "__main__":
    key = jax.random.PRNGKey(0)
    k1, k2, k3, k4 = jax.random.split(key, 4)

    # Small-C case (exercises the lane-dense, channel-transposed kernel).
    B, a, b, C = 2, 16, 16, 4
    N, wf = a * b, b // 2 + 1
    x = jax.random.normal(k1, (B, N, C), dtype=jnp.float32)
    w = jax.random.normal(k2, (a, wf, C, 2), dtype=jnp.float32) * 0.02

    out = jax.block_until_ready(global_filter(x, w))
    ref = _reference_numpy(np.asarray(x), np.asarray(w), a, b)
    assert out.shape == (B, N, C) and out.dtype == jnp.float32
    assert np.allclose(np.asarray(out), ref, atol=2e-3, rtol=2e-3), \
        "channel-transposed path mismatch vs FFT reference"

    # 128-multiple-C case (exercises the channels-last kernel with a C-tile grid axis),
    # with a native bf16 input (no wrapper-side f32 cast).
    C2 = 128
    x2 = jax.random.normal(k3, (B, N, C2), dtype=jnp.bfloat16)
    w2 = jax.random.normal(k4, (a, wf, C2, 2), dtype=jnp.float32) * 0.02

    out2 = jax.block_until_ready(global_filter(x2, w2))
    ref2 = _reference_numpy(np.asarray(x2).astype(np.float32), np.asarray(w2), a, b)
    assert out2.shape == (B, N, C2) and out2.dtype == jnp.float32
    assert np.allclose(np.asarray(out2), ref2, atol=4e-3, rtol=4e-3), \
        "channels-last path mismatch vs FFT reference"

    print("KERNEL_OK")
</pallas_src>

<mosaic_0001>
module attributes {stable_mosaic.version = 11 : i64} {
  func.func @_gf_kernel_ct(%arg0: i32, %arg1: memref<1x256x4xf32, #tpu.memory_space<vmem>>, %arg2: memref<256x144xbf16, #tpu.memory_space<vmem>>, %arg3: memref<256x144xbf16, #tpu.memory_space<vmem>>, %arg4: memref<4x144xf32, #tpu.memory_space<vmem>>, %arg5: memref<4x144xf32, #tpu.memory_space<vmem>>, %arg6: memref<144x256xbf16, #tpu.memory_space<vmem>>, %arg7: memref<144x256xbf16, #tpu.memory_space<vmem>>, %arg8: memref<1x4x256xf32, #tpu.memory_space<vmem>>) attributes {dimension_semantics = [#tpu.dimension_semantics<parallel>], iteration_bounds = array<i64: 2>, scalar_prefetch = 0 : i64, scratch_operands = 0 : i64, tpu.core_type = #tpu.core_type<tc>, window_params = [{transform_indices = @transform_0, window_bounds = array<i64: 1, 256, 4>}, {pipeline_mode = #tpu.pipeline_mode<synchronous>, transform_indices = @transform_1, window_bounds = array<i64: 256, 144>}, {pipeline_mode = #tpu.pipeline_mode<synchronous>, transform_indices = @transform_2, window_bounds = array<i64: 256, 144>}, {pipeline_mode = #tpu.pipeline_mode<synchronous>, transform_indices = @transform_3, window_bounds = array<i64: 4, 144>}, {pipeline_mode = #tpu.pipeline_mode<synchronous>, transform_indices = @transform_4, window_bounds = array<i64: 4, 144>}, {pipeline_mode = #tpu.pipeline_mode<synchronous>, transform_indices = @transform_5, window_bounds = array<i64: 144, 256>}, {pipeline_mode = #tpu.pipeline_mode<synchronous>, transform_indices = @transform_6, window_bounds = array<i64: 144, 256>}, {transform_indices = @transform_7, window_bounds = array<i64: 1, 4, 256>}]} {
    %c0 = arith.constant 0 : index
    %c0_0 = arith.constant 0 : index
    %c0_1 = arith.constant 0 : index
    %0 = vector.load %arg1[%c0, %c0_0, %c0_1] : memref<1x256x4xf32, #tpu.memory_space<vmem>>, vector<1x256x4xf32>
    %1 = vector.shape_cast %0 : vector<1x256x4xf32> to vector<256x4xf32>
    %2 = arith.truncf %1 : vector<256x4xf32> to vector<256x4xbf16>
    %c0_2 = arith.constant 0 : index
    %c0_3 = arith.constant 0 : index
    %3 = vector.load %arg2[%c0_2, %c0_3] : memref<256x144xbf16, #tpu.memory_space<vmem>>, vector<256x144xbf16>
    %cst = arith.constant dense<0.000000e+00> : vector<4x144xf32>
    %4 = tpu.matmul %2, %3, %cst {dimension_numbers = #tpu.dot_dimension_numbers<[0], [0], [1], [1], [0, 1, 1, 1], [], []>} : vector<256x4xbf16>, vector<256x144xbf16>, vector<4x144xf32> -> vector<4x144xf32>
    %c0_4 = arith.constant 0 : index
    %c0_5 = arith.constant 0 : index
    %5 = vector.load %arg3[%c0_4, %c0_5] : memref<256x144xbf16, #tpu.memory_space<vmem>>, vector<256x144xbf16>
    %cst_6 = arith.constant dense<0.000000e+00> : vector<4x144xf32>
    %6 = tpu.matmul %2, %5, %cst_6 {dimension_numbers = #tpu.dot_dimension_numbers<[0], [0], [1], [1], [0, 1, 1, 1], [], []>} : vector<256x4xbf16>, vector<256x144xbf16>, vector<4x144xf32> -> vector<4x144xf32>
    %c0_7 = arith.constant 0 : index
    %c0_8 = arith.constant 0 : index
    %7 = vector.load %arg4[%c0_7, %c0_8] : memref<4x144xf32, #tpu.memory_space<vmem>>, vector<4x144xf32>
    %c0_9 = arith.constant 0 : index
    %c0_10 = arith.constant 0 : index
    %8 = vector.load %arg5[%c0_9, %c0_10] : memref<4x144xf32, #tpu.memory_space<vmem>>, vector<4x144xf32>
    %9 = arith.mulf %4, %7 : vector<4x144xf32>
    %10 = arith.mulf %6, %8 : vector<4x144xf32>
    %11 = arith.subf %9, %10 : vector<4x144xf32>
    %12 = arith.truncf %11 : vector<4x144xf32> to vector<4x144xbf16>
    %13 = arith.mulf %4, %8 : vector<4x144xf32>
    %14 = arith.mulf %6, %7 : vector<4x144xf32>
    %15 = arith.addf %13, %14 : vector<4x144xf32>
    %16 = arith.truncf %15 : vector<4x144xf32> to vector<4x144xbf16>
    %c0_11 = arith.constant 0 : index
    %c0_12 = arith.constant 0 : index
    %17 = vector.load %arg6[%c0_11, %c0_12] : memref<144x256xbf16, #tpu.memory_space<vmem>>, vector<144x256xbf16>
    %cst_13 = arith.constant dense<0.000000e+00> : vector<4x256xf32>
    %18 = tpu.matmul %12, %17, %cst_13 {dimension_numbers = #tpu.dot_dimension_numbers<[1], [0], [0], [1], [0, 0, 1, 1], [], []>} : vector<4x144xbf16>, vector<144x256xbf16>, vector<4x256xf32> -> vector<4x256xf32>
    %c0_14 = arith.constant 0 : index
    %c0_15 = arith.constant 0 : index
    %19 = vector.load %arg7[%c0_14, %c0_15] : memref<144x256xbf16, #tpu.memory_space<vmem>>, vector<144x256xbf16>
    %cst_16 = arith.constant dense<0.000000e+00> : vector<4x256xf32>
    %20 = tpu.matmul %16, %19, %cst_16 {dimension_numbers = #tpu.dot_dimension_numbers<[1], [0], [0], [1], [0, 0, 1, 1], [], []>} : vector<4x144xbf16>, vector<144x256xbf16>, vector<4x256xf32> -> vector<4x256xf32>
    %21 = arith.addf %18, %20 : vector<4x256xf32>
    %c0_17 = arith.constant 0 : index
    %c0_18 = arith.constant 0 : index
    %c0_19 = arith.constant 0 : index
    %22 = vector.load %arg8[%c0_17, %c0_18, %c0_19] : memref<1x4x256xf32, #tpu.memory_space<vmem>>, vector<1x4x256xf32>
    %23 = vector.shape_cast %22 : vector<1x4x256xf32> to vector<4x256xf32>
    %24 = vector.shape_cast %21 : vector<4x256xf32> to vector<1x4x256xf32>
    tpu.vector_store %arg8[%c0_17, %c0_18, %c0_19], %24 {strides = array<i32>} : memref<1x4x256xf32, #tpu.memory_space<vmem>>, vector<1x4x256xf32>,
    return
  }
  func.func @transform_0(%arg0: i32) -> (i32, i32, i32) {
    %c0_i32 = arith.constant 0 : i32
    %c0_i32_0 = arith.constant 0 : i32
    %c0_i32_1 = arith.constant 0 : i32
    return %arg0, %c0_i32, %c0_i32_0 : i32, i32, i32
  }
  func.func @transform_1(%arg0: i32) -> (i32, i32) {
    %c0_i32 = arith.constant 0 : i32
    %c0_i32_0 = arith.constant 0 : i32
    %c0_i32_1 = arith.constant 0 : i32
    return %c0_i32, %c0_i32_0 : i32, i32
  }
  func.func @transform_2(%arg0: i32) -> (i32, i32) {
    %c0_i32 = arith.constant 0 : i32
    %c0_i32_0 = arith.constant 0 : i32
    %c0_i32_1 = arith.constant 0 : i32
    return %c0_i32, %c0_i32_0 : i32, i32
  }
  func.func @transform_3(%arg0: i32) -> (i32, i32) {
    %c0_i32 = arith.constant 0 : i32
    %c0_i32_0 = arith.constant 0 : i32
    %c0_i32_1 = arith.constant 0 : i32
    return %c0_i32, %c0_i32_0 : i32, i32
  }
  func.func @transform_4(%arg0: i32) -> (i32, i32) {
    %c0_i32 = arith.constant 0 : i32
    %c0_i32_0 = arith.constant 0 : i32
    %c0_i32_1 = arith.constant 0 : i32
    return %c0_i32, %c0_i32_0 : i32, i32
  }
  func.func @transform_5(%arg0: i32) -> (i32, i32) {
    %c0_i32 = arith.constant 0 : i32
    %c0_i32_0 = arith.constant 0 : i32
    %c0_i32_1 = arith.constant 0 : i32
    return %c0_i32, %c0_i32_0 : i32, i32
  }
  func.func @transform_6(%arg0: i32) -> (i32, i32) {
    %c0_i32 = arith.constant 0 : i32
    %c0_i32_0 = arith.constant 0 : i32
    %c0_i32_1 = arith.constant 0 : i32
    return %c0_i32, %c0_i32_0 : i32, i32
  }
  func.func @transform_7(%arg0: i32) -> (i32, i32, i32) {
    %c0_i32 = arith.constant 0 : i32
    %c0_i32_0 = arith.constant 0 : i32
    %c0_i32_1 = arith.constant 0 : i32
    return %arg0, %c0_i32, %c0_i32_0 : i32, i32, i32
  }
}

</mosaic_0001>

<bundles_post_ra>
// kernel: _gf_ct_impl.1
= control target key start
LH: loop header
LB: loop body
LE: loop exit
PB: predicated region body
PF: predicated region fallthrough
CT: control target
= control target key end

     0   :  { %12 = vsyncpa [#allocation3], 0  ;;  %s2081_s0 = inlined_call_operand.vmem [shape: f32[2,256,4], index: 0, kind: input, shape index: {}]   ;;  %s2082_s1 = inlined_call_operand.vmem [shape: bf16[256,144], index: 1, kind: input, shape index: {}]   ;;  %s2083_s2 = inlined_call_operand.vmem [shape: bf16[256,144], index: 2, kind: input, shape index: {}]   ;;  %s2084_s3 = inlined_call_operand.vmem [shape: f32[4,144], index: 3, kind: input, shape index: {}]   ;;  %s2085_s4 = inlined_call_operand.vmem [shape: f32[4,144], index: 4, kind: input, shape index: {}]   ;;  %s2086_s5 = inlined_call_operand.vmem [shape: bf16[144,256], index: 5, kind: input, shape index: {}]   ;;  %s2087_s6 = inlined_call_operand.vmem [shape: bf16[144,256], index: 6, kind: input, shape index: {}]   ;;  %s2088_s7 = inlined_call_operand.hbm [shape: f32[2,4,256], index: 7, kind: output, shape index: {}]  }
   0x1   :  { %14 = vsyncpa [#allocation3 + $0x1], 0  ;;  %s1642_s24 = smov 0   ;;  %s1644_s25 = smov 0  }
   0x2   :  { %s1646_s26 = smov 0   ;;  %s1648_s27 = smov 0  }
   0x3 LB: > { %s1663_s28 = sadd.s32 4294967295, %s1599_s27   ;;  %s1232_s29 = sadd.s32 4294967294, %s1599_s27   ;;  %s1599_s27 = sphi %s1648_s27, %s2094_s27   ;;  %s1595_s26 = sphi %s1646_s26, %s2093_s26   ;;  %s1591_s25 = sphi %s1644_s25, %s2092_s25   ;;  %s1587_s24 = sphi %s1642_s24, %s2091_s24  }
   0x4   : > { %s1667_s30 = sadd.s32 1, %s1599_s27   ;;  %s179_s8 = sadd.s32 1, %s1595_s26 }
   0x5   : > { %s176_s9 = ssub.s32 %s1599_s27, %s1667_s30  ;;  %p189_p0 = scmp.ne.s32.totalorder %s1595_s26, %s1591_s25 }
   0x6   : > { %p177_p1 = scmp.eq.s32.totalorder %s176_s9, 0  ;;  %p190_p2 = scmp.eq.s32.totalorder %s1663_s28, 1 }
   0x7   : > { %p195_p3 = scmp.ne.s32.totalorder %s1591_s25, %s1587_s24  ;;  %p196_p4 = scmp.eq.s32.totalorder %s1232_s29, 1 }
   0x8   : > { %s1678_s10 = scalar_select %p177_p1, %s1595_s26, %s179_s8  }
   0x9   : > { %p1680_p5 = por %p190_p2, %p189_p0  ;;  %p1684_p6 = por %p196_p4, %p195_p3 }
   0xa   : > { %p1235_p7 = scmp.ge.s32.totalorder %s1599_s27, 1  ;;  %p240_p8 = scmp.lt.s32.totalorder %s1599_s27, 3 }
   0xc   : > { %p241_p9 = pnand %p1235_p7, %p240_p8 }
   0xd   : > { %p272_p10 = scmp.lt.s32.totalorder (!%p241_p9), %s1663_s28, 1  ;;  %s269_s14 = sand.u32 (!%p241_p9), 1, %s1591_s25  }
   0xe   : > { %244 = sbr.rel (%p241_p9) target bundleno = 540 (0x21c), region = 48  ;;  %s1236_s15 = sshll.u32 (!%p241_p9), %s269_s14, 3 }
   0xf   : > { %s1347_s16 = sshll.u32 (!%p241_p9), %s1663_s28, 7  ;;  %s1601_s23 = smov (!%p241_p9), [#allocation2]  }
  0x10   : > { %s2040_s22 = scalar_lea.hbm (!%p241_p9), %s2088_s7, %s1347_s16 }
  0x13   : > { %v1387_v0 = vld [vmem:[%s2082_s1 + $0x74] ss:$8 sps:$4 sm:$0xff]   ;;  %s273_s17 = scalar_select %p272_p10, %s1663_s28, 1  ;;  %v1391_v2 = vld [vmem:[%s2082_s1 + $0x70] ss:$8 sps:$4 sm:$0xff]   ;;  %vm974_vm0 = vcmask 130048  }
  0x14   : > { %v1389_v1 = vld [vmem:[%s2083_s2 + $0x74] ss:$8 sps:$4 sm:$0xff]   ;;  %550 = vmatprep.subr.bf16.mxu0 %v1387_v0  ;;  %v1392_v3 = vld [vmem:[%s2083_s2 + $0x70] ss:$8 sps:$4 sm:$0xff]   ;;  %v1393_v4 = vld [vmem:[%s2082_s1 + $0x64] ss:$8 sps:$4 sm:$0xff]  }
  0x15   : > { %783 = vmatprep.subr.bf16.mxu1 %v1389_v1  ;;  %s1346_s29 = sshll.u32 %s273_s17, 8  ;;  %551 = vmatpush1.bf16.msra.mxu0 %v1391_v2  ;;  %v1395_v5 = vld [vmem:[%s2083_s2 + $0x64] ss:$8 sps:$4 sm:$0xff]   ;;  %v1397_v6 = vld [vmem:[%s2082_s1 + $0x60] ss:$8 sps:$4 sm:$0xff]   ;;  %s271_s17 = scalar_lea.vmem [#allocation2], %s1236_s15 }
  0x16   : > { %784 = vmatpush1.bf16.msra.mxu1 %v1392_v3  ;;  %s1716_s18 = scalar_lea.vmem %s2081_s0, %s1346_s29  ;;  %552 = vmatprep.subr.bf16.mxu0 %v1393_v4  ;;  %v1398_v7 = vld [vmem:[%s2083_s2 + $0x60] ss:$8 sps:$4 sm:$0xff]   ;;  %v1399_v32 = vld [vmem:[%s2082_s1 + $0x54] ss:$8 sps:$4 sm:$0xff]   ;;  %v1403_v38 = vld [vmem:[%s2082_s1 + $0x50] ss:$8 sps:$4 sm:$0xff]  }
  0x17   : > { %v294_v8 = vld [vmem:[%s1716_s18 + $0x80] sm:$0xff]  ;;  %v295_v9 = vld [vmem:[%s1716_s18 + $0x88] sm:$0xff]  ;;  %785 = vmatprep.subr.bf16.mxu1 %v1395_v5  ;;  %v296_v13 = vld [vmem:[%s1716_s18 + $0x90] sm:$0xff]  ;;  %s1173_s19 = sshll.u32 %s271_s17, 4  ;;  %s1159_s28 = scalar_lea.sflag [#allocation3], %s269_s14  ;;  %s2042_s19 = int_to_ptr.vmem [resolvable:$true] %s1173_s19 }
  0x18   : > { %v278_v10 = vld [vmem:[%s1716_s18] sm:$0xff]  ;;  %v318_v11 = vpack.c.bf16 %v295_v9, %v294_v8  ;;  %v279_v12 = vld [vmem:[%s1716_s18 + $0x8] sm:$0xff]  ;;  %v297_v14 = vld [vmem:[%s1716_s18 + $0x98] sm:$0xff]  ;;  %s1543_s29 = sshll.u32 %s1601_s23, 4  ;;  %s1544_s29 = int_to_ptr.vmem [resolvable:$false] %s1543_s29 }
  0x19   : > { %v310_v15 = vpack.c.bf16 %v279_v12, %v278_v10  ;;  %v280_v16 = vld [vmem:[%s1716_s18 + $0x10] sm:$0xff]  ;;  %v281_v17 = vld [vmem:[%s1716_s18 + $0x18] sm:$0xff]  ;;  %553 = vmatpush1.bf16.msra.mxu0 %v1397_v6  ;;  %v319_v18 = vpack.c.bf16 %v297_v14, %v296_v13  ;;  %v298_v20 = vld [vmem:[%s1716_s18 + $0xa0] sm:$0xff]  ;;  %s1545_s8 = scalar_lea.vmem %s1544_s29, 256  ;;  %p1546_p0 = scmp.lt.s32.totalorder %s2042_s19, %s1544_s29 }
  0x1a   : > { %786 = vmatpush1.bf16.msra.mxu1 %v1398_v7  ;;  %374 = vxpose.xlu0.c.b16.start [1/8] (narrow) %v318_v11, 16  ;;  %v311_v19 = vpack.c.bf16 %v281_v17, %v280_v16  ;;  %v299_v21 = vld [vmem:[%s1716_s18 + $0xa8] sm:$0xff]  ;;  %v282_v22 = vld [vmem:[%s1716_s18 + $0x20] sm:$0xff]  ;;  %v300_v26 = vld [vmem:[%s1716_s18 + $0xb0] sm:$0xff] }
  0x1b   : > { %358 = vxpose.xlu1.c.b16.start [1/8] (narrow) %v310_v15, 16  ;;  %v283_v23 = vld [vmem:[%s1716_s18 + $0x28] sm:$0xff]  ;;  %v320_v24 = vpack.c.bf16 %v299_v21, %v298_v20  ;;  %v301_v27 = vld [vmem:[%s1716_s18 + $0xb8] sm:$0xff]  ;;  %v284_v28 = vld [vmem:[%s1716_s18 + $0x30] sm:$0xff]  ;;  %554 = vmatprep.subr.bf16.mxu0 %v1399_v32 }
  0x1c   : > { %v312_v25 = vpack.c.bf16 %v283_v23, %v282_v22  ;;  %v285_v29 = vld [vmem:[%s1716_s18 + $0x38] sm:$0xff]  ;;  %v302_v30 = vld [vmem:[%s1716_s18 + $0xc0] sm:$0xff]  ;;  %v303_v31 = vld [vmem:[%s1716_s18 + $0xc8] sm:$0xff]  ;;  %v321_v33 = vpack.c.bf16 %v301_v27, %v300_v26 }
  0x1d   : > { %v286_v34 = vld [vmem:[%s1716_s18 + $0x40] sm:$0xff]  ;;  %v287_v35 = vld [vmem:[%s1716_s18 + $0x48] sm:$0xff]  ;;  %v1401_v36 = vld [vmem:[%s2083_s2 + $0x54] ss:$8 sps:$4 sm:$0xff]   ;;  %v313_v37 = vpack.c.bf16 %v285_v29, %v284_v28  ;;  %555 = vmatpush1.bf16.msra.mxu0 %v1403_v38  ;;  %v322_v45 = vpack.c.bf16 %v303_v31, %v302_v30 }
  0x1e   : > { %375 = vxpose.xlu0.c.b16.cont [2/8] (narrow) %v319_v18, 16  ;;  %v1404_v39 = vld [vmem:[%s2083_s2 + $0x50] ss:$8 sps:$4 sm:$0xff]   ;;  %787 = vmatprep.subr.bf16.mxu1 %v1401_v36  ;;  %v1405_v40 = vld [vmem:[%s2082_s1 + $0x44] ss:$8 sps:$4 sm:$0xff]   ;;  %v314_v48 = vpack.c.bf16 %v287_v35, %v286_v34 }
  0x1f   : > { %359 = vxpose.xlu1.c.b16.cont [2/8] (narrow) %v311_v19, 16  ;;  %v304_v41 = vld [vmem:[%s1716_s18 + $0xd0] sm:$0xff]  ;;  %v305_v42 = vld [vmem:[%s1716_s18 + $0xd8] sm:$0xff]  ;;  %788 = vmatpush1.bf16.msra.mxu1 %v1404_v39  ;;  %v1407_v43 = vld [vmem:[%s2083_s2 + $0x44] ss:$8 sps:$4 sm:$0xff]  }
  0x20   : > { %v1409_v44 = vld [vmem:[%s2082_s1 + $0x40] ss:$8 sps:$4 sm:$0xff]   ;;  %v288_v46 = vld [vmem:[%s1716_s18 + $0x50] sm:$0xff]  ;;  %556 = vmatprep.subr.bf16.mxu0 %v1405_v40  ;;  %789 = vmatprep.subr.bf16.mxu1 %v1407_v43  ;;  %v289_v50 = vld [vmem:[%s1716_s18 + $0x58] sm:$0xff]  ;;  %v323_v56 = vpack.c.bf16 %v305_v42, %v304_v41 }
  0x21   : > { %v1410_v47 = vld [vmem:[%s2083_s2 + $0x40] ss:$8 sps:$4 sm:$0xff]   ;;  %v1411_v49 = vld [vmem:[%s2082_s1 + $0x34] ss:$8 sps:$4 sm:$0xff]   ;;  %v1415_v52 = vld [vmem:[%s2082_s1 + $0x30] ss:$8 sps:$4 sm:$0xff]   ;;  %557 = vmatpush1.bf16.msra.mxu0 %v1409_v44  ;;  %v315_v58 = vpack.c.bf16 %v289_v50, %v288_v46 }
  0x22   : > { %376 = vxpose.xlu0.c.b16.cont [3/8] (narrow) %v320_v24, 16  ;;  %v1413_v51 = vld [vmem:[%s2083_s2 + $0x34] ss:$8 sps:$4 sm:$0xff]   ;;  %v306_v53 = vld [vmem:[%s1716_s18 + $0xe0] sm:$0xff]  ;;  %v307_v54 = vld [vmem:[%s1716_s18 + $0xe8] sm:$0xff]  ;;  %558 = vmatprep.subr.bf16.mxu0 %v1411_v49 }
  0x23   : > { %360 = vxpose.xlu1.c.b16.cont [3/8] (narrow) %v312_v25, 16  ;;  %790 = vmatpush1.bf16.msra.mxu1 %v1410_v47  ;;  %v1416_v55 = vld [vmem:[%s2083_s2 + $0x30] ss:$8 sps:$4 sm:$0xff]   ;;  %v1417_v57 = vld [vmem:[%s2082_s1 + $0x24] ss:$8 sps:$4 sm:$0xff]   ;;  %v324_v2 = vpack.c.bf16 %v307_v54, %v306_v53 }
  0x24   : > { %v290_v59 = vld [vmem:[%s1716_s18 + $0x60] sm:$0xff]  ;;  %791 = vmatprep.subr.bf16.mxu1 %v1413_v51  ;;  %v291_v61 = vld [vmem:[%s1716_s18 + $0x68] sm:$0xff]  ;;  %v308_v62 = vld [vmem:[%s1716_s18 + $0xf0] sm:$0xff] }
  0x25   : > { %v1419_v60 = vld [vmem:[%s2083_s2 + $0x24] ss:$8 sps:$4 sm:$0xff]   ;;  %v309_v63 = vld [vmem:[%s1716_s18 + $0xf8] sm:$0xff]  ;;  %559 = vmatpush1.bf16.msra.mxu0 %v1415_v52  ;;  %v1421_v0 = vld [vmem:[%s2082_s1 + $0x20] ss:$8 sps:$4 sm:$0xff]   ;;  %v316_v4 = vpack.c.bf16 %v291_v61, %v290_v59 }
  0x26   : > { %377 = vxpose.xlu0.c.b16.cont [4/8] (narrow) %v321_v33, 16  ;;  %v1422_v1 = vld [vmem:[%s2083_s2 + $0x20] ss:$8 sps:$4 sm:$0xff]   ;;  %560 = vmatprep.subr.bf16.mxu0 %v1417_v57  ;;  %v1423_v3 = vld [vmem:[%s2082_s1 + $0x14] ss:$8 sps:$4 sm:$0xff]   ;;  %v325_v10 = vpack.c.bf16 %v309_v63, %v308_v62 }
  0x27   : > { %361 = vxpose.xlu1.c.b16.cont [4/8] (narrow) %v313_v37, 16  ;;  %792 = vmatpush1.bf16.msra.mxu1 %v1416_v55  ;;  %v1425_v5 = vld [vmem:[%s2083_s2 + $0x14] ss:$8 sps:$4 sm:$0xff]   ;;  %v1427_v8 = vld [vmem:[%s2082_s1 + $0x10] ss:$8 sps:$4 sm:$0xff]  }
  0x28   : > { %793 = vmatprep.subr.bf16.mxu1 %v1419_v60  ;;  %v292_v6 = vld [vmem:[%s1716_s18 + $0x70] sm:$0xff]  ;;  %v293_v7 = vld [vmem:[%s1716_s18 + $0x78] sm:$0xff]  ;;  %v1429_v11 = vld [vmem:[%s2082_s1 + $0x4] ss:$8 sps:$4 sm:$0xff]   ;;  %s1539_s18 = scalar_lea.vmem %s2042_s19, 128 }
  0x29   : > { %561 = vmatpush1.bf16.msra.mxu0 %v1421_v0  ;;  %v1428_v9 = vld [vmem:[%s2083_s2 + $0x10] ss:$8 sps:$4 sm:$0xff]   ;;  %v317_v12 = vpack.c.bf16 %v293_v7, %v292_v6  ;;  %v1431_v13 = vld [vmem:[%s2083_s2 + $0x4] ss:$8 sps:$4 sm:$0xff]   ;;  %v1433_v14 = vld [vmem:[%s2082_s1] ss:$8 sps:$4 sm:$0xff]   ;;  %p1540_p11 = scmp.ne.s32.totalorder %s2042_s19, %s1539_s18  ;;  %p1547_p1 = scmp.lt.s32.totalorder %s1545_s8, %s1539_s18 }
  0x2a   : > { %378 = vxpose.xlu0.c.b16.cont [5/8] (narrow) %v322_v45, 16  ;;  %562 = vmatprep.subr.bf16.mxu0 %v1423_v3  ;;  %v1434_v15 = vld [vmem:[%s2083_s2] ss:$8 sps:$4 sm:$0xff]   ;;  %v1435_v16 = vld [vmem:[%s2082_s1 + $0xf4] ss:$8 sps:$4 sm:$0xff]  }
  0x2b   : > { %362 = vxpose.xlu1.c.b16.cont [5/8] (narrow) %v314_v48, 16  ;;  %794 = vmatpush1.bf16.msra.mxu1 %v1422_v1  ;;  %v1437_v17 = vld [vmem:[%s2083_s2 + $0xf4] ss:$8 sps:$4 sm:$0xff]   ;;  %v1439_v18 = vld [vmem:[%s2082_s1 + $0xf0] ss:$8 sps:$4 sm:$0xff]   ;;  %p1541_p12 = pnand %p1540_p11, %p1680_p5  ;;  %p1548_p2 = por %p1547_p1, %p1546_p0 }
  0x2c   : > { %795 = vmatprep.subr.bf16.mxu1 %v1425_v5  ;;  %v1440_v19 = vld [vmem:[%s2083_s2 + $0xf0] ss:$8 sps:$4 sm:$0xff]   ;;  %v1441_v20 = vld [vmem:[%s2082_s1 + $0xe4] ss:$8 sps:$4 sm:$0xff]   ;;  %v1445_v22 = vld [vmem:[%s2082_s1 + $0xe0] ss:$8 sps:$4 sm:$0xff]  }
  0x2d   : > { %563 = vmatpush1.bf16.msra.mxu0 %v1427_v8  ;;  %v1443_v21 = vld [vmem:[%s2083_s2 + $0xe4] ss:$8 sps:$4 sm:$0xff]   ;;  %v1446_v23 = vld [vmem:[%s2083_s2 + $0xe0] ss:$8 sps:$4 sm:$0xff]   ;;  %v1447_v24 = vld [vmem:[%s2082_s1 + $0xd4] ss:$8 sps:$4 sm:$0xff]   ;;  %p1542_p13 = pneg %p1541_p12 }
  0x2e   : > { %379 = vxpose.xlu0.c.b16.cont [6/8] (narrow) %v323_v56, 16  ;;  %564 = vmatprep.subr.bf16.mxu0 %v1429_v11  ;;  %v1449_v25 = vld [vmem:[%s2083_s2 + $0xd4] ss:$8 sps:$4 sm:$0xff]   ;;  %v1451_v26 = vld [vmem:[%s2082_s1 + $0xd0] ss:$8 sps:$4 sm:$0xff]  }
  0x2f   : > { %363 = vxpose.xlu1.c.b16.cont [6/8] (narrow) %v315_v58, 16  ;;  %796 = vmatpush1.bf16.msra.mxu1 %v1428_v9  ;;  %v1452_v27 = vld [vmem:[%s2083_s2 + $0xd0] ss:$8 sps:$4 sm:$0xff]   ;;  %v1453_v28 = vld [vmem:[%s2082_s1 + $0xc4] ss:$8 sps:$4 sm:$0xff]   ;;  %p1549_p3 = pnand %p1548_p2, %p1542_p13 }
  0x30   : > { %797 = vmatprep.subr.bf16.mxu1 %v1431_v13  ;;  %v1455_v29 = vld [vmem:[%s2083_s2 + $0xc4] ss:$8 sps:$4 sm:$0xff]   ;;  %v1457_v30 = vld [vmem:[%s2082_s1 + $0xc0] ss:$8 sps:$4 sm:$0xff]   ;;  %v1459_v32 = vld [vmem:[%s2082_s1 + $0xb4] ss:$8 sps:$4 sm:$0xff]  }
  0x31   : > { %565 = vmatpush1.bf16.msra.mxu0 %v1433_v14  ;;  %v1458_v31 = vld [vmem:[%s2083_s2 + $0xc0] ss:$8 sps:$4 sm:$0xff]   ;;  %v1461_v33 = vld [vmem:[%s2083_s2 + $0xb4] ss:$8 sps:$4 sm:$0xff]   ;;  %v1463_v34 = vld [vmem:[%s2082_s1 + $0xb0] ss:$8 sps:$4 sm:$0xff]  }
  0x32   : > { %380 = vxpose.xlu0.c.b16.cont [7/8] (narrow) %v324_v2, 16  ;;  %566 = vmatprep.subr.bf16.mxu0 %v1435_v16  ;;  %v1464_v35 = vld [vmem:[%s2083_s2 + $0xb0] ss:$8 sps:$4 sm:$0xff]   ;;  %v1465_v36 = vld [vmem:[%s2082_s1 + $0xa4] ss:$8 sps:$4 sm:$0xff]  }
  0x33   : > { %364 = vxpose.xlu1.c.b16.cont [7/8] (narrow) %v316_v4, 16  ;;  %798 = vmatpush1.bf16.msra.mxu1 %v1434_v15  ;;  %v1467_v37 = vld [vmem:[%s2083_s2 + $0xa4] ss:$8 sps:$4 sm:$0xff]   ;;  %v1469_v38 = vld [vmem:[%s2082_s1 + $0xa0] ss:$8 sps:$4 sm:$0xff]  }
  0x34   : > { %799 = vmatprep.subr.bf16.mxu1 %v1437_v17  ;;  %v1470_v39 = vld [vmem:[%s2083_s2 + $0xa0] ss:$8 sps:$4 sm:$0xff]   ;;  %v1471_v40 = vld [vmem:[%s2082_s1 + $0x94] ss:$8 sps:$4 sm:$0xff]   ;;  %v1475_v42 = vld [vmem:[%s2082_s1 + $0x90] ss:$8 sps:$4 sm:$0xff]  }
  0x35   : > { %567 = vmatpush2.bf16.msra.mxu0 %v1439_v18  ;;  %v1473_v41 = vld [vmem:[%s2083_s2 + $0x94] ss:$8 sps:$4 sm:$0xff]   ;;  %v1476_v43 = vld [vmem:[%s2083_s2 + $0x90] ss:$8 sps:$4 sm:$0xff]   ;;  %v1477_v44 = vld [vmem:[%s2082_s1 + $0x84] ss:$8 sps:$4 sm:$0xff]  }
  0x36   : > { %381 = vxpose.xlu0.c.b16.end [8/8] (narrow) %v325_v10, 16  ;;  %568 = vmatprep.subr.bf16.mxu0 %v1441_v20  ;;  %v1479_v45 = vld [vmem:[%s2083_s2 + $0x84] ss:$8 sps:$4 sm:$0xff]   ;;  %v1481_v46 = vld [vmem:[%s2082_s1 + $0x80] ss:$8 sps:$4 sm:$0xff]  }
  0x37   : > { %365 = vxpose.xlu1.c.b16.end [8/8] (narrow) %v317_v12, 16  ;;  %800 = vmatpush2.bf16.msra.mxu1 %v1440_v19  ;;  %v1482_v47 = vld [vmem:[%s2083_s2 + $0x80] ss:$8 sps:$4 sm:$0xff]   ;;  %v1485_v48 = vld [vmem:[%s2087_s6 + $0x74] ss:$8 sps:$4 sm:$0xff]  }
  0x38   : > { %801 = vmatprep.subr.bf16.mxu1 %v1443_v21  ;;  %v1488_v49 = vld [vmem:[%s2086_s5 + $0x74] ss:$8 sps:$4 sm:$0xff]   ;;  %v1483_v50 = vld [vmem:[%s2087_s6 + $0x70] ss:$8 sps:$4 sm:$0xff]   ;;  %v1491_v53 = vld [vmem:[%s2087_s6 + $0x64] ss:$8 sps:$4 sm:$0xff]  }
  0x39   : > { %569 = vmatpush2.bf16.msra.mxu0 %v1445_v22  ;;  %v1486_v51 = vld [vmem:[%s2086_s5 + $0x70] ss:$8 sps:$4 sm:$0xff]   ;;  %v1494_v54 = vld [vmem:[%s2086_s5 + $0x64] ss:$8 sps:$4 sm:$0xff]   ;;  %v1489_v56 = vld [vmem:[%s2087_s6 + $0x60] ss:$8 sps:$4 sm:$0xff]  }
  0x3a   : > { %570 = vmatprep.subr.bf16.mxu0 %v1447_v24  ;;  %v1492_v57 = vld [vmem:[%s2086_s5 + $0x60] ss:$8 sps:$4 sm:$0xff]   ;;  %v1497_v58 = vld [vmem:[%s2087_s6 + $0x54] ss:$8 sps:$4 sm:$0xff]   ;;  %v1495_v60 = vld [vmem:[%s2087_s6 + $0x50] ss:$8 sps:$4 sm:$0xff]  }
  0x3b   : > { %802 = vmatpush2.bf16.msra.mxu1 %v1446_v23  ;;  %v1500_v59 = vld [vmem:[%s2086_s5 + $0x54] ss:$8 sps:$4 sm:$0xff]   ;;  %v1498_v61 = vld [vmem:[%s2086_s5 + $0x50] ss:$8 sps:$4 sm:$0xff]   ;;  %v1503_v62 = vld [vmem:[%s2087_s6 + $0x44] ss:$8 sps:$4 sm:$0xff]  }
  0x3c   : > { %803 = vmatprep.subr.bf16.mxu1 %v1449_v25  ;;  %v1506_v63 = vld [vmem:[%s2086_s5 + $0x44] ss:$8 sps:$4 sm:$0xff]   ;;  %v1501_v0 = vld [vmem:[%s2087_s6 + $0x40] ss:$8 sps:$4 sm:$0xff]   ;;  %v1509_v2 = vld [vmem:[%s2087_s6 + $0x34] ss:$8 sps:$4 sm:$0xff]  }
  0x3d   : > { %571 = vmatpush2.bf16.msra.mxu0 %v1451_v26  ;;  %v1504_v1 = vld [vmem:[%s2086_s5 + $0x40] ss:$8 sps:$4 sm:$0xff]   ;;  %v1512_v3 = vld [vmem:[%s2086_s5 + $0x34] ss:$8 sps:$4 sm:$0xff]   ;;  %v1507_v4 = vld [vmem:[%s2087_s6 + $0x30] ss:$8 sps:$4 sm:$0xff]  }
  0x3e   : > { %572 = vmatprep.subr.bf16.mxu0 %v1453_v28  ;;  %v1510_v5 = vld [vmem:[%s2086_s5 + $0x30] ss:$8 sps:$4 sm:$0xff]   ;;  %v1515_v6 = vld [vmem:[%s2087_s6 + $0x24] ss:$8 sps:$4 sm:$0xff]   ;;  %v1513_v8 = vld [vmem:[%s2087_s6 + $0x20] ss:$8 sps:$4 sm:$0xff]  }
  0x3f   : > { %804 = vmatpush2.bf16.msra.mxu1 %v1452_v27  ;;  %v1518_v7 = vld [vmem:[%s2086_s5 + $0x24] ss:$8 sps:$4 sm:$0xff]   ;;  %v1516_v9 = vld [vmem:[%s2086_s5 + $0x20] ss:$8 sps:$4 sm:$0xff]   ;;  %v1521_v10 = vld [vmem:[%s2087_s6 + $0x14] ss:$8 sps:$4 sm:$0xff]  }
  0x40   : > { %805 = vmatprep.subr.bf16.mxu1 %v1455_v29  ;;  %v1524_v11 = vld [vmem:[%s2086_s5 + $0x14] ss:$8 sps:$4 sm:$0xff]   ;;  %v1519_v12 = vld [vmem:[%s2087_s6 + $0x10] ss:$8 sps:$4 sm:$0xff]   ;;  %v1529_v14 = vld [vmem:[%s2087_s6 + $0x4] ss:$8 sps:$4 sm:$0xff]  }
  0x41   : > { %573 = vmatpush2.bf16.msra.mxu0 %v1457_v30  ;;  %v1522_v13 = vld [vmem:[%s2086_s5 + $0x10] ss:$8 sps:$4 sm:$0xff]   ;;  %v1532_v15 = vld [vmem:[%s2086_s5 + $0x4] ss:$8 sps:$4 sm:$0xff]   ;;  %v1527_v16 = vld [vmem:[%s2087_s6] ss:$8 sps:$4 sm:$0xff]  }
  0x42   : > { %574 = vmatprep.subr.bf16.mxu0 %v1459_v32  ;;  %v1530_v17 = vld [vmem:[%s2086_s5] ss:$8 sps:$4 sm:$0xff]   ;;  %v1535_v18 = vld [vmem:[%s2087_s6 + $0x84] ss:$8 sps:$4 sm:$0xff]  }
  0x43   : > { %806 = vmatpush2.bf16.msra.mxu1 %v1458_v31  ;;  %v1538_v19 = vld [vmem:[%s2086_s5 + $0x84] ss:$8 sps:$4 sm:$0xff]   ;;  %v1533_v20 = vld [vmem:[%s2087_s6 + $0x80] ss:$8 sps:$4 sm:$0xff]  }
  0x44   : > { %807 = vmatprep.subr.bf16.mxu1 %v1461_v33  ;;  %v1536_v21 = vld [vmem:[%s2086_s5 + $0x80] ss:$8 sps:$4 sm:$0xff]  }
  0x45   : > { %575 = vmatpush2.bf16.msra.mxu0 %v1463_v34  ;;  %v824_v22 = vld [vmem:[%s2084_s3] sm:$0xff] }
  0x46   : > { %576 = vmatprep.subr.bf16.mxu0 %v1465_v36  ;;  %v825_v23 = vld [vmem:[%s2085_s4] sm:$0xff]  ;;  %v827_v24 = vcombine.high %v824_v22, %v824_v22 }
  0x47   : > { %808 = vmatpush2.bf16.msra.mxu1 %v1464_v35  ;;  %v832_v25 = vcombine.high %v825_v23, %v825_v23 }
  0x48   : > { %809 = vmatprep.subr.bf16.mxu1 %v1467_v37 }
  0x49   : > { %577 = vmatpush2.bf16.msra.mxu0 %v1469_v38 }
  0x4a   : > { %578 = vmatprep.subr.bf16.mxu0 %v1471_v40 }
  0x4b   : > { %810 = vmatpush2.bf16.msra.mxu1 %v1470_v39 }
  0x4c   : > { %811 = vmatprep.subr.bf16.mxu1 %v1473_v41 }
  0x4d   : > { %579 = vmatpush2.bf16.msra.mxu0 %v1475_v42 }
  0x4e   : > { %580 = vmatprep.subr.bf16.mxu0 %v1477_v44 }
  0x4f   : > { %812 = vmatpush2.bf16.msra.mxu1 %v1476_v43 }
  0x50   : > { %813 = vmatprep.subr.bf16.mxu1 %v1479_v45 }
  0x51   : > { %581 = vmatpush2.bf16.msra.mxu0 %v1481_v46 }
  0x52   : > { %978 = vmatprep.subr.bf16.mxu0 %v1485_v48 }
  0x53   : > { %814 = vmatpush2.bf16.msra.mxu1 %v1482_v47 }
  0x54   : > { %1112 = vmatprep.subr.bf16.mxu1 %v1488_v49 }
  0x7c   : > { %v382_v52 = vpop.trf.xlu0 }
  0x7d   : > { %582 = vmatprep.mubr.bf16.mxu0 %v382_v52  ;;  %815 = vmatprep.mubr.bf16.mxu1 %v382_v52  ;;  %v366_v55 = vpop.trf.xlu1 }
  0x7e   : > { %583 = vmatmul.mubr.bf16.vlgmr.msra.gmra.mxu0 %v366_v55  ;;  %816 = vmatmul.mubr.bf16.vlgmr.msra.gmra.mxu1 %v366_v55 }
  0x7f   : > { %979 = vmatpush1.bf16.msra.mxu0 %v1483_v50  ;;  %1113 = vmatpush1.bf16.msra.mxu1 %v1486_v51 }
  0x80   : > { %980 = vmatprep.subr.bf16.mxu0 %v1491_v53  ;;  %1114 = vmatprep.subr.bf16.mxu1 %v1494_v54 }
  0x83   : > { %981 = vmatpush1.bf16.msra.mxu0 %v1489_v56  ;;  %1115 = vmatpush1.bf16.msra.mxu1 %v1492_v57 }
  0x84   : > { %982 = vmatprep.subr.bf16.mxu0 %v1497_v58  ;;  %1116 = vmatprep.subr.bf16.mxu1 %v1500_v59 }
  0x87   : > { %983 = vmatpush1.bf16.msra.mxu0 %v1495_v60  ;;  %1117 = vmatpush1.bf16.msra.mxu1 %v1498_v61 }
  0x88   : > { %984 = vmatprep.subr.bf16.mxu0 %v1503_v62  ;;  %1118 = vmatprep.subr.bf16.mxu1 %v1506_v63 }
  0x8b   : > { %985 = vmatpush1.bf16.msra.mxu0 %v1501_v0  ;;  %1119 = vmatpush1.bf16.msra.mxu1 %v1504_v1 }
  0x8c   : > { %986 = vmatprep.subr.bf16.mxu0 %v1509_v2  ;;  %1120 = vmatprep.subr.bf16.mxu1 %v1512_v3 }
  0x8f   : > { %987 = vmatpush1.bf16.msra.mxu0 %v1507_v4  ;;  %1121 = vmatpush1.bf16.msra.mxu1 %v1510_v5 }
  0x90   : > { %988 = vmatprep.subr.bf16.mxu0 %v1515_v6  ;;  %1122 = vmatprep.subr.bf16.mxu1 %v1518_v7 }
  0x93   : > { %989 = vmatpush1.bf16.msra.mxu0 %v1513_v8  ;;  %1123 = vmatpush1.bf16.msra.mxu1 %v1516_v9 }
  0x94   : > { %990 = vmatprep.subr.bf16.mxu0 %v1521_v10  ;;  %1124 = vmatprep.subr.bf16.mxu1 %v1524_v11 }
  0x97   : > { %991 = vmatpush1.bf16.msra.mxu0 %v1519_v12  ;;  %1125 = vmatpush1.bf16.msra.mxu1 %v1522_v13 }
  0x98   : > { %992 = vmatprep.subr.bf16.mxu0 %v1529_v14  ;;  %1126 = vmatprep.subr.bf16.mxu1 %v1532_v15 }
  0x9b   : > { %993 = vmatpush1.bf16.msra.mxu0 %v1527_v16  ;;  %1127 = vmatpush1.bf16.msra.mxu1 %v1530_v17 }
  0x9c   : > { %1008 = vmatprep.subr.bf16.mxu0 %v1535_v18  ;;  %1142 = vmatprep.subr.bf16.mxu1 %v1538_v19 }
  0x9f   : > { %1009 = vmatpush2.bf16.msra.mxu0 %v1533_v20  ;;  %1143 = vmatpush2.bf16.msra.mxu1 %v1536_v21 }
 0x13e   : > { %v584_v26 = vpop.f32.mrf.mxu0  ;;  %v817_v27 = vpop.f32.mrf.mxu1 }
 0x13f   : > { %v829_v28 = vmul.f32 %v824_v22, %v584_v26  ;;  %v840_v29 = vmul.f32 %v825_v23, %v584_v26  ;;  %v834_v30 = vmul.f32 %v825_v23, %v817_v27  ;;  %v842_v31 = vmul.f32 %v824_v22, %v817_v27 }
 0x140   : > { %v586_v32 = vpop.f32.mrf.mxu0  ;;  %v819_v33 = vpop.f32.mrf.mxu1 }
 0x141   : > { %v830_v34 = vmul.f32 %v827_v24, %v586_v32  ;;  %v841_v35 = vmul.f32 %v832_v25, %v586_v32  ;;  %v835_v36 = vmul.f32 %v832_v25, %v819_v33  ;;  %v843_v37 = vmul.f32 %v827_v24, %v819_v33 }
 0x142   : > { %v588_v38 = vpop.f32.mrf.mxu0  ;;  %v821_v39 = vpop.f32.mrf.mxu1  ;;  %v836_v40 = vsub.f32 %v829_v28, %v834_v30  ;;  %v844_v41 = vadd.f32 %v842_v31, %v840_v29 }
 0x143   : > { %v837_v42 = vsub.f32 %v830_v34, %v835_v36  ;;  %v845_v43 = vadd.f32 %v843_v37, %v841_v35 }
 0x144   : > { %v589_v44 = vpop.f32.mrf.mxu0  ;;  %v822_v45 = vpop.f32.mrf.mxu1  ;;  %v838_v48 = vpack.c.bf16 %v836_v40, %v836_v40  ;;  %v846_v49 = vpack.c.bf16 %v844_v41, %v844_v41 }
 0x145   : > { %v839_v46 = vpack.c.bf16 %v837_v42, %v837_v42  ;;  %v847_v47 = vpack.c.bf16 %v845_v43, %v845_v43 }
 0x147   : > { %1321 = vmatprep.mubr.msk.bf16.mxu0 %vm974_vm0, %v847_v47  ;;  %1340 = vmatprep.mubr.msk.bf16.mxu1 %vm974_vm0, %v839_v46 }
 0x148   : > { %1011 = vmatmul.mubr.bf16.vlgmr.msra.gmra.mxu0 %v846_v49  ;;  %1145 = vmatmul.mubr.bf16.vlgmr.msra.gmra.mxu1 %v838_v48 }
 0x208   : > { %v1012_v50 = vpop.f32.mrf.mxu0  ;;  %v1146_v51 = vpop.f32.mrf.mxu1 }
 0x209   : > { %v1147_v54 = vadd.f32 %v1146_v51, %v1012_v50 }
 0x20a   : > { %v1014_v52 = vpop.f32.mrf.mxu0  ;;  %v1148_v53 = vpop.f32.mrf.mxu1 }
 0x20b   : > { %v1149_v55 = vadd.f32 %v1148_v53, %v1014_v52 }
 0x20c   : > { %v1016_v56 = vpop.f32.mrf.mxu0  ;;  %v1150_v57 = vpop.f32.mrf.mxu1 }
 0x20d   : > { %v1155_v58 = vcombine.low %v1147_v54, %v1149_v55 }
 0x20e   : > { %v1017_v59 = vpop.f32.mrf.mxu0  ;;  %v1151_v60 = vpop.f32.mrf.mxu1 }
 0x20f   : > { %1157 = vst [vmem:[%s271_s17] sm:$0xff] %v1155_v58 }
 0x210   : > { %1552 = shalt.err (!%p1549_p3)
}
 0x211   : > { %s1553_s9 = scalar_lea.hbm %s2040_s22, 128  ;;  %s1557_s15 = scalar_lea.hbm %s2088_s7, 256 }
 0x212   : > { %p1554_p4 = scmp.ne.s32.totalorder %s2040_s22, %s1553_s9  ;;  %p1558_p9 = scmp.lt.s32.totalorder %s2040_s22, %s2088_s7 }
 0x213   : > { %p1559_p10 = scmp.lt.s32.totalorder %s1557_s15, %s1553_s9 }
 0x214   : > { %p1555_p7 = pnand %p1554_p4, %p1680_p5 }
 0x215   : > { %p1560_p11 = por %p1559_p10, %p1558_p9 }
 0x216   : > { %p1556_p8 = pneg %p1555_p7 }
 0x218   : > { %p1561_p12 = pnand %p1560_p11, %p1556_p8 }
 0x21a   : > { %1564 = shalt.err (!%p1561_p12)
}
 0x21b   : > { %1348 = dma.vmem_to_hbm [thread:$0]  (%p1680_p5), %s2042_s19, 128, %s2040_s22, %s1159_s28  }
 0x21c PF: > { %p1354_p13 = scmp.ge.s32.totalorder %s1599_s27, 2  ;;  %s1185_s20 = sand.u32 1, %s1587_s24  }
 0x21d   : > { %s1186_s21 = scalar_lea.sflag [#allocation3], %s1185_s20 }
 0x21e   : > { %p1351_p0 = pnand %p1354_p13, %p1684_p6 }
 0x220   : > { %p1352_p1 = pneg %p1351_p0 }
 0x222   : > { %1582 = dma.done.wait (%p1352_p1), %s1186_s21, 128  }
 0x223   : > { %1584 = vsyncadd (%p1352_p1), %s1186_s21, 4294967168  ;;  %p17_p2 = scmp.ge.s32.totalorder %s1667_s30, 4   ;;  %s2091_s24 = smov %s1591_s25 }
 0x224   : > { %s2092_s25 = smov %s1595_s26  ;;  %s2093_s26 = smov %s1678_s10 }
 0x225   : > { %s2094_s27 = smov %s1667_s30  ;;  %19 = sbr.rel (!%p17_p2) target bundleno = 3 (0x3), region = 83 }
 0x22a   :  { %1191 = vsyncpa [#allocation3], 1 }
 0x22b   :  { %1193 = vsyncpa [#allocation3 + $0x1], 1 }

</bundles_post_ra>
